<compile_context>
chip_gen: v5e
topology: v5e:2x2
jax: 0.10.0
libtpu: 0.0.40
codegen_flags: <defaults>
</compile_context>

<pallas_src>
import jax
import jax.numpy as jnp
from jax.experimental import pallas as pl
from jax.experimental.pallas import tpu as pltpu


def _time_sum_kernel(x_ref, ctx_ref, acc_ref):
    """Accumulate the sum over the (packed) time axis of one batch slab.

    x_ref  : (NB, BT, Fp) input slab (Fp lane-dense, BT on sublanes)
    ctx_ref: (NB, Fp) f32 output, resident across the T grid axis
    acc_ref: (NB, Fp) f32 scratch accumulator
    """
    t = pl.program_id(1)

    @pl.when(t == 0)
    def _():
        acc_ref[...] = jnp.zeros_like(acc_ref)

    # f32 accumulation regardless of input dtype (VPU/XLU slack is free under
    # the HBM roofline; avoids bf16 accumulation error for long T).
    acc_ref[...] += jnp.sum(x_ref[...].astype(jnp.float32), axis=1)

    @pl.when(t == pl.num_programs(1) - 1)
    def _():
        ctx_ref[...] = acc_ref[...]


def _vmem_capacity_bytes():
    try:
        cap = int(pltpu.get_tpu_info().vmem_capacity_bytes)
        if cap > 0:
            return cap
    except Exception:
        pass
    return 64 << 20  # conservative fallback (v7x-sized)


def _num_tensorcores():
    # v7x has 2 TensorCores per chip; v5e/v6e have 1.  Best-effort detection;
    # on failure assume 1 (only affects the optional grid split, not results).
    try:
        kind = jax.devices()[0].device_kind.lower()
        return 2 if "v7" in kind else 1
    except Exception:
        return 1


def attention_layer(x, w1, b1, w2, b2, *, interpret=False):
    """Pallas forward of AttentionLayer (eval mode).

    x: (B, T, F).  w1/b1/w2/b2 are the scores-MLP nn.Linear parameters; they
    provably do not influence the outputs (softmax over a size-1 axis is
    identically 1.0 for finite scores), so they are not shipped to the kernel
    (saves 4 weight DMAs and all MXU/EUP work).
    Returns (context (B, F), attention_weights (B, T, 1)).
    """
    del w1, b1, w2, b2  # dead w.r.t. outputs -- see module-level comment.
    B, T, F = x.shape
    itemsize = jnp.dtype(x.dtype).itemsize

    # --- Lane packing: fold g = 128 // F time steps into lanes when F < 128
    # so loads / stores are 128-lane dense (the reshape is free / contiguous).
    g = 1
    if F < 128 and 128 % F == 0 and T % (128 // F) == 0:
        g = 128 // F
    Tp, Fp = T // g, g * F
    x_packed = x.reshape(B, Tp, Fp)

    # --- Byte-budgeted, generation-aware block sizing.
    vmem_cap = _vmem_capacity_bytes()
    # One x buffer in the multi-MiB range; ~vmem/6 keeps the double-buffered
    # footprint near ~1/3 of physical VMEM (~21 MiB on v7x, ~42 MiB on
    # v5e/v6e), capped at 16 MiB per buffer.
    per_buf_budget = max(1 << 20, min(16 << 20, vmem_cap // 6))

    row_bytes = Tp * Fp * itemsize
    block_b = max(1, min(B, per_buf_budget // row_bytes))

    # Megacore split (2-TC parts only): keep >= num_tc programs when each
    # TensorCore still gets a multi-MiB slab.
    num_tc = _num_tensorcores()
    if num_tc >= 2 and B >= num_tc:
        per_core_b = pl.cdiv(B, num_tc)
        if per_core_b * row_bytes >= (4 << 20):
            block_b = min(block_b, per_core_b)

    # (8, 128) layout rule for the (block_b, Fp) output tile: block_b must be
    # a sublane multiple unless it spans the full batch.
    if block_b < B:
        block_b = max(8, (block_b // 8) * 8)
        if block_b >= B:
            block_b = B

    # --- Optional T-axis reduction grid: bounds the working set when a single
    # batch row already exceeds the per-buffer budget (very long sequences).
    block_t = Tp
    if block_b == 1 and row_bytes > per_buf_budget:
        budget_rows = max(8, (per_buf_budget // (Fp * itemsize)) // 8 * 8)
        for cand in range(min(budget_rows, (Tp // 8) * 8), 7, -8):
            if Tp % cand == 0:   # exact divisor: never reduce over padded rows
                block_t = cand
                break
        # If no multiple-of-8 divisor fits, keep block_t = Tp (correct, just a
        # larger slab).

    grid = (pl.cdiv(B, block_b), pl.cdiv(Tp, block_t))

    # --- VMEM limit sized to the double-buffered footprint (+ headroom).
    x_block_bytes = block_b * block_t * Fp * itemsize
    ctx_block_bytes = block_b * Fp * 4
    footprint = 2 * x_block_bytes + 2 * ctx_block_bytes + ctx_block_bytes
    vmem_limit = max(footprint + (2 << 20), 16 << 20)
    vmem_limit = max(4 << 20, min(vmem_limit, vmem_cap - (8 << 20)))

    ctx_f32 = pl.pallas_call(
        _time_sum_kernel,
        out_shape=jax.ShapeDtypeStruct((B, Fp), jnp.float32),
        grid=grid,
        in_specs=[pl.BlockSpec((block_b, block_t, Fp), lambda b, t: (b, t, 0))],
        out_specs=pl.BlockSpec((block_b, Fp), lambda b, t: (b, 0)),
        scratch_shapes=[pltpu.VMEM((block_b, Fp), jnp.float32)],
        compiler_params=pltpu.CompilerParams(
            dimension_semantics=("parallel", "arbitrary"),
            vmem_limit_bytes=int(vmem_limit),
        ),
        interpret=interpret,
    )(x_packed)

    # Fold the g lane-packed groups back to F (tiny, fused by XLA) and cast.
    if g > 1:
        ctx_f32 = ctx_f32.reshape(B, g, F).sum(axis=1)
    context = ctx_f32.astype(x.dtype)

    # Softmax over the size-1 axis is identically 1.0 -> constant weights,
    # produced off the kernel's critical path (no second store stream).
    attention_weights = jnp.ones((B, T, 1), x.dtype)

    # TODO(synk): training-mode Dropout(0.3) (Bernoulli mask via pltpu.prng_*)
    # is not emitted; eval semantics only (it would not change the outputs
    # anyway, since the softmax over a size-1 axis is identically 1.0).
    return context, attention_weights


def reference(x, w1, b1, w2, b2):
    """Literal pure-JAX transcription of the PyTorch forward (eval mode)."""
    B, T, F = x.shape
    xr = x.reshape(-1, F)
    h = jnp.tanh(xr @ w1 + b1[0])
    s = h @ w2 + b2[0]                                 # (B*T, 1)
    w = jax.nn.softmax(s, axis=1)                      # size-1 axis -> exactly 1
    w = w.reshape(B, T, 1)
    ctx = jnp.sum(x * w, axis=1)
    return ctx, w


if __name__ == "__main__":
    B, T, F, H = 2, 8, 32, 64

    key = jax.random.PRNGKey(0)
    kx, k1, k2, k3, k4 = jax.random.split(key, 5)

    x = jax.random.normal(kx, (B, T, F), dtype=jnp.float32)

    # Deterministic parameter init mimicking nn.Linear (uniform +-1/sqrt(fan_in)).
    bound1 = 1.0 / jnp.sqrt(F)
    w1 = jax.random.uniform(k1, (F, H), jnp.float32, -bound1, bound1)
    b1 = jax.random.uniform(k2, (1, H), jnp.float32, -bound1, bound1)
    bound2 = 1.0 / jnp.sqrt(H)
    w2 = jax.random.uniform(k3, (H, 1), jnp.float32, -bound2, bound2)
    b2 = jax.random.uniform(k4, (1, 1), jnp.float32, -bound2, bound2)

    ctx, attw = attention_layer(x, w1, b1, w2, b2)
    jax.block_until_ready((ctx, attw))

    ctx_ref, attw_ref = reference(x, w1, b1, w2, b2)
    assert ctx.shape == (B, F) and attw.shape == (B, T, 1)
    assert jnp.allclose(ctx, ctx_ref, atol=1e-5, rtol=1e-5)
    assert jnp.allclose(attw, attw_ref, atol=1e-6, rtol=1e-6)
    assert jnp.all(attw == 1.0)  # softmax over a size-1 axis is identically 1

    print("KERNEL_OK")
</pallas_src>

<mosaic_0001>
module attributes {stable_mosaic.version = 11 : i64} {
  func.func @_time_sum_kernel(%arg0: i32, %arg1: i32, %arg2: memref<2x2x128xf32, #tpu.memory_space<vmem>>, %arg3: memref<2x128xf32, #tpu.memory_space<vmem>>, %arg4: memref<2x128xf32, #tpu.memory_space<vmem>>) attributes {dimension_semantics = [#tpu.dimension_semantics<parallel>, #tpu.dimension_semantics<arbitrary>], iteration_bounds = array<i64: 1, 1>, scalar_prefetch = 0 : i64, scratch_operands = 1 : i64, tpu.core_type = #tpu.core_type<tc>, window_params = [{transform_indices = @transform_0, window_bounds = array<i64: 2, 2, 128>}, {transform_indices = @transform_1, window_bounds = array<i64: 2, 128>}]} {
    %c0_i32 = arith.constant 0 : i32
    %0 = arith.cmpi eq, %arg1, %c0_i32 : i32
    %1 = arith.extui %0 : i1 to i32
    %c0_i32_0 = arith.constant 0 : i32
    %2 = arith.cmpi ne, %1, %c0_i32_0 : i32
    scf.if %2 {
      %cst_9 = arith.constant 0.000000e+00 : f32
      %11 = vector.broadcast %cst_9 : f32 to vector<2x128xf32>
      %c0_10 = arith.constant 0 : index
      %c0_11 = arith.constant 0 : index
      %12 = vector.load %arg4[%c0_10, %c0_11] : memref<2x128xf32, #tpu.memory_space<vmem>>, vector<2x128xf32>
      tpu.vector_store %arg4[%c0_10, %c0_11], %11 {strides = array<i32>} : memref<2x128xf32, #tpu.memory_space<vmem>>, vector<2x128xf32>,
    } else {
    }
    %c0 = arith.constant 0 : index
    %c0_1 = arith.constant 0 : index
    %3 = vector.load %arg4[%c0, %c0_1] : memref<2x128xf32, #tpu.memory_space<vmem>>, vector<2x128xf32>
    %c0_2 = arith.constant 0 : index
    %c0_3 = arith.constant 0 : index
    %c0_4 = arith.constant 0 : index
    %4 = vector.load %arg2[%c0_2, %c0_3, %c0_4] : memref<2x2x128xf32, #tpu.memory_space<vmem>>, vector<2x2x128xf32>
    %cst = arith.constant dense<0.000000e+00> : vector<2x128xf32>
    %5 = vector.multi_reduction <add>, %4, %cst [1] : vector<2x2x128xf32> to vector<2x128xf32>
    %6 = arith.addf %3, %5 : vector<2x128xf32>
    %c0_5 = arith.constant 0 : index
    %c0_6 = arith.constant 0 : index
    %7 = vector.load %arg4[%c0_5, %c0_6] : memref<2x128xf32, #tpu.memory_space<vmem>>, vector<2x128xf32>
    tpu.vector_store %arg4[%c0_5, %c0_6], %6 {strides = array<i32>} : memref<2x128xf32, #tpu.memory_space<vmem>>, vector<2x128xf32>,
    %c0_i32_7 = arith.constant 0 : i32
    %8 = arith.cmpi eq, %arg1, %c0_i32_7 : i32
    %9 = arith.extui %8 : i1 to i32
    %c0_i32_8 = arith.constant 0 : i32
    %10 = arith.cmpi ne, %9, %c0_i32_8 : i32
    scf.if %10 {
      %c0_9 = arith.constant 0 : index
      %c0_10 = arith.constant 0 : index
      %11 = vector.load %arg4[%c0_9, %c0_10] : memref<2x128xf32, #tpu.memory_space<vmem>>, vector<2x128xf32>
      %c0_11 = arith.constant 0 : index
      %c0_12 = arith.constant 0 : index
      %12 = vector.load %arg3[%c0_11, %c0_12] : memref<2x128xf32, #tpu.memory_space<vmem>>, vector<2x128xf32>
      tpu.vector_store %arg3[%c0_11, %c0_12], %11 {strides = array<i32>} : memref<2x128xf32, #tpu.memory_space<vmem>>, vector<2x128xf32>,
    } else {
    }
    return
  }
  func.func @transform_0(%arg0: i32, %arg1: i32) -> (i32, i32, i32) {
    %c0_i32 = arith.constant 0 : i32
    %c0_i32_0 = arith.constant 0 : i32
    return %arg0, %arg1, %c0_i32 : i32, i32, i32
  }
  func.func @transform_1(%arg0: i32, %arg1: i32) -> (i32, i32) {
    %c0_i32 = arith.constant 0 : i32
    %c0_i32_0 = arith.constant 0 : i32
    return %arg0, %c0_i32 : i32, i32
  }
}

</mosaic_0001>

<bundles_post_ra>
// kernel: tpu_custom_call.1
= control target key start
LH: loop header
LB: loop body
LE: loop exit
PB: predicated region body
PF: predicated region fallthrough
CT: control target
= control target key end

     0   :  { %6 = vsyncpa [#allocation4], 0  ;;  %s155_s0 = inlined_call_operand.hbm [shape: f32[2,2,128], index: 0, kind: input, shape index: {}]   ;;  %s156_s1 = inlined_call_operand.hbm [shape: f32[2,128], index: 1, kind: output, shape index: {}]  }
   0x1   :  { %7 = vsyncpa [#allocation5], 0  ;;  %s12_s8 = sshll.u32 %s155_s0, 4  ;;  %s134_s9 = smov [#allocation3]   ;;  %s13_s8 = int_to_ptr.hbm [resolvable:$true] %s12_s8 }
   0x2   :  { %s14_s10 = sshll.u32 %s134_s9, 4  ;;  %s135_s11 = smov 32   ;;  %s15_s10 = int_to_ptr.vmem [resolvable:$true] %s14_s10 }
   0x3   :  { %s136_s12 = smov 2  }
   0x4   :  { %20 = dma.hbm_to_vmem [thread:$0]  %s13_s8, 64, %s15_s10, [#allocation4], %s135_s11, %s135_s11, %s136_s12  }
   0x5   :  { %130 = dma.done.wait [#allocation4], 64  }
   0x6   :  { %131 = vsyncadd [#allocation4], 4294967232  ;;  %v137_v0 = vmov 0.0   ;;  %vm33_vm0 = vcmask 1041408   ;;  %v31_v1 = vld [vmem:[#allocation3] sm:$0x3] }
   0x7   :  { %29 = vst [vmem:[#allocation2] sm:$0x3] %v137_v0  ;;  %v32_v2 = vld [vmem:[#allocation3 + $0x2] sm:$0x3]  ;;  %v34_v3 = vsel %vm33_vm0, %v31_v1, 0.0  ;;  %vm50_vm1 = vcmask 1041409  }
   0x8   :  { %v41_v4 = vsel %vm33_vm0, %v32_v2, 0.0  ;;  %v35_v5 = vrot.slane %v34_v3, 4  ;;  %s138_s0 = smov [#allocation6]   ;;  %s67_s16 = sshll.u32 %s156_s1, 4  ;;  %s68_s16 = int_to_ptr.hbm [resolvable:$true] %s67_s16 }
   0x9   :  { %v42_v6 = vrot.slane %v41_v4, 4  ;;  %s65_s13 = sshll.u32 %s138_s0, 4  ;;  %s66_s13 = int_to_ptr.vmem [resolvable:$true] %s65_s13 }
   0xa   :  { %v36_v7 = vadd.f32 %v35_v5, %v34_v3 }
   0xb   :  { %v43_v8 = vadd.f32 %v42_v6, %v41_v4 }
   0xc   :  { %v37_v9 = vrot.slane %v36_v7, 2 }
   0xd   :  { %v44_v10 = vrot.slane %v43_v8, 2 }
   0xe   :  { %v38_v11 = vadd.f32 %v37_v9, %v36_v7  ;;  %v30_v15 = vld [vmem:[#allocation2] sm:$0x3] }
   0xf   :  { %v45_v12 = vadd.f32 %v44_v10, %v43_v8 }
  0x10   :  { %v39_v13 = vrot.slane %v38_v11, 1 }
  0x11   :  { %v46_v14 = vrot.slane %v45_v12, 1 }
  0x12   :  { %v40_v16 = vadd.f32 %v39_v13, %v38_v11 }
  0x13   :  { %v47_v17 = vadd.f32 %v46_v14, %v45_v12 }
  0x15   :  { %v51_v18 = vsel %vm50_vm1, %v47_v17, %v40_v16 }
  0x16   :  { %v53_v19 = vadd.f32 %v51_v18, %v30_v15 }
  0x18   :  { %54 = vst [vmem:[#allocation2] sm:$0x3] %v53_v19 }
  0x1f   :  { %v58_v20 = vld [vmem:[#allocation2] sm:$0x3] }
  0x20   :  { %59 = vst [vmem:[#allocation6] sm:$0x3] %v58_v20 }
  0x21   :  { %70 = dma.vmem_to_hbm [thread:$0]  %s66_s13, 32, %s68_s16, [#allocation5]  }
  0x22   :  { %132 = dma.done.wait [#allocation5], 32  }
  0x23   :  { %133 = vsyncadd [#allocation5], 4294967264 }
  0x24   :  { %75 = vsyncpa [#allocation4], 1 }
  0x25   :  { %76 = vsyncpa [#allocation5], 1 }

</bundles_post_ra>
